<compile_context>
chip_gen: v6e
topology: v6e:2x2x1
jax: 0.10.0
libtpu: 0.0.40
codegen_flags: <defaults>
</compile_context>

<pallas_src>
import functools

import jax
import jax.numpy as jnp
import numpy as np
from jax.experimental import pallas as pl
from jax.experimental.pallas import tpu as pltpu


# ----------------------------------------------------------------------------
# Kernels
# ----------------------------------------------------------------------------
def _fused_linear_single_k_kernel(x_ref, w_ref, b_ref, o_ref):
    # Whole K fits in one tile: single MXU pass, bias folded in, direct store.
    acc = jnp.dot(x_ref[...], w_ref[...], preferred_element_type=jnp.float32)
    o_ref[...] = (acc + b_ref[...].astype(jnp.float32)).astype(o_ref.dtype)


def _fused_linear_acc_kernel(x_ref, w_ref, b_ref, o_ref, acc_ref):
    # x_ref: (tm, tk)  w_ref: (tk, tn)  b_ref: (1, tn)  o_ref/acc_ref: (tm, tn)
    k = pl.program_id(2)

    @pl.when(k == 0)
    def _():
        # Seed the accumulator with the bias (resident tile, constant over i,k)
        # instead of zeros + epilogue add.
        acc_ref[...] = jnp.broadcast_to(
            b_ref[...].astype(jnp.float32), acc_ref.shape)

    acc_ref[...] += jnp.dot(
        x_ref[...], w_ref[...], preferred_element_type=jnp.float32)

    @pl.when(k == pl.num_programs(2) - 1)
    def _():
        o_ref[...] = acc_ref[...].astype(o_ref.dtype)


# ----------------------------------------------------------------------------
# Tiling helpers
# ----------------------------------------------------------------------------
def _sublane_align(dtype):
    # 8 for f32, 16 for bf16, 32 for int8 (sub-32-bit packs along sublanes).
    return max(8, 32 // jnp.dtype(dtype).itemsize)


def _round_up(n, m):
    return ((n + m - 1) // m) * m


def _pad2d(x, rows, cols):
    r, c = x.shape
    if r == rows and c == cols:
        return x
    return jnp.pad(x, ((0, rows - r), (0, cols - c)))


def _choose_tile(dim, target, align):
    """Largest tile <= target that divides `dim` and is a multiple of `align`.
    `dim` is pre-padded to a multiple of `align`, so this always terminates."""
    t = min(dim, max(align, (target // align) * align))
    while dim % t != 0:
        t -= align
    return t


def _vmem_bytes(tm, tn, tk, itemsize, multi_k):
    dbl = 2  # double-buffered pipeline stages
    x_b = tm * tk * itemsize * dbl
    w_b = tk * tn * itemsize * dbl
    b_b = 8 * tn * itemsize * dbl       # bias tile (sublane-padded), tiny
    o_b = tm * tn * itemsize * dbl
    acc_b = tm * tn * 4 if multi_k else 0
    return x_b + w_b + b_b + o_b + acc_b


_VMEM_BUDGET = 24 * 1024 * 1024          # v7x-safe double-buffered footprint
_VMEM_LIMIT = 32 * 1024 * 1024           # explicit scoped limit (>= v5e default)


# ----------------------------------------------------------------------------
# One-time parameter prep (hoisted out of the hot path)
# ----------------------------------------------------------------------------
def fuse_receptor_params(weights, biases):
    """weights: (R, in_dim, out_dim), biases: (R, out_dim).

    Returns (w_fused, b_fused) with
        w_fused: (Kp, Np)  where Kp = round_up(in_dim, 128), Np = round_up(R*out_dim, 128)
        b_fused: (1,  Np)
    Fuses all receptors along N so the forward is a single GEMM.  Do this ONCE
    (parameter-prep / cache), not per forward call.
    """
    R, in_dim, out_dim = weights.shape
    N = R * out_dim
    w = jnp.transpose(weights, (1, 0, 2)).reshape(in_dim, N)
    b = biases.reshape(1, N)
    Kp = _round_up(in_dim, 128)
    Np = _round_up(N, 128)
    return _pad2d(w, Kp, Np), _pad2d(b, 1, Np)


# ----------------------------------------------------------------------------
# Forward
# ----------------------------------------------------------------------------
@functools.partial(jax.jit, static_argnames=("receptors", "out_dim"))
def multi_scale_receptors(x, w_fused, b_fused, *, receptors, out_dim):
    """x: (B, in_dim); w_fused/b_fused from fuse_receptor_params().

    Returns (B, receptors, out_dim), matching the PyTorch module's forward.
    """
    B, in_dim = x.shape
    Kp, Np = w_fused.shape
    N = receptors * out_dim
    itemsize = jnp.dtype(x.dtype).itemsize
    m_align = _sublane_align(x.dtype)

    # Pad activations to aligned tiles (zero K padding contributes nothing).
    Bp = _round_up(B, m_align)
    xp = _pad2d(x, Bp, Kp)

    # Tile selection: M as large as B allows (weights streamed once), deep K,
    # moderate N; shrink under the v7x-safe VMEM budget.
    tm = _choose_tile(Bp, min(Bp, 512), m_align)
    tn = _choose_tile(Np, 512, 128)
    tk = _choose_tile(Kp, 2048, 128)
    while True:
        multi_k = (Kp // tk) > 1
        if _vmem_bytes(tm, tn, tk, itemsize, multi_k) <= _VMEM_BUDGET:
            break
        if tn > 128:
            tn = _choose_tile(Np, tn // 2, 128)
        elif tk > 128:
            tk = _choose_tile(Kp, tk // 2, 128)
        elif tm > m_align:
            tm = _choose_tile(Bp, tm // 2, m_align)
        else:
            break

    # v7x megacore: if both parallel axes collapsed to a single block, split N
    # so the second TensorCore gets work (no effect on v5e/v6e correctness).
    if (Bp // tm) == 1 and (Np // tn) == 1 and Np >= 256:
        tn = _choose_tile(Np, Np // 2, 128)

    k_steps = Kp // tk

    if k_steps == 1:
        # Single-K specialization: no f32 scratch, no RMW epilogue.
        grid = (Bp // tm, Np // tn)
        grid_spec = pltpu.PrefetchScalarGridSpec(
            num_scalar_prefetch=0,
            grid=grid,
            in_specs=[
                pl.BlockSpec((tm, tk), lambda i, j: (i, 0)),
                pl.BlockSpec((tk, tn), lambda i, j: (0, j)),
                pl.BlockSpec((1, tn), lambda i, j: (0, j)),
            ],
            out_specs=pl.BlockSpec((tm, tn), lambda i, j: (i, j)),
            scratch_shapes=[],
        )
        kernel = _fused_linear_single_k_kernel
        semantics = ("parallel", "parallel")
    else:
        grid = (Bp // tm, Np // tn, k_steps)
        grid_spec = pltpu.PrefetchScalarGridSpec(
            num_scalar_prefetch=0,
            grid=grid,
            in_specs=[
                pl.BlockSpec((tm, tk), lambda i, j, k: (i, k)),
                pl.BlockSpec((tk, tn), lambda i, j, k: (k, j)),
                pl.BlockSpec((1, tn), lambda i, j, k: (0, j)),
            ],
            out_specs=pl.BlockSpec((tm, tn), lambda i, j, k: (i, j)),
            scratch_shapes=[pltpu.VMEM((tm, tn), jnp.float32)],
        )
        kernel = _fused_linear_acc_kernel
        semantics = ("parallel", "parallel", "arbitrary")

    y = pl.pallas_call(
        kernel,
        out_shape=jax.ShapeDtypeStruct((Bp, Np), x.dtype),
        grid_spec=grid_spec,
        compiler_params=pltpu.CompilerParams(
            dimension_semantics=semantics,
            vmem_limit_bytes=_VMEM_LIMIT,
        ),
    )(xp, w_fused, b_fused)

    # Drop padding, then zero-copy row-major reshape (B, R*out_dim)->(B, R, out_dim).
    return y[:B, :N].reshape(B, receptors, out_dim)


# ----------------------------------------------------------------------------
# Reference + demo
# ----------------------------------------------------------------------------
def _reference(x, weights, biases):
    outs = [x @ weights[r] + biases[r] for r in range(weights.shape[0])]
    return jnp.transpose(jnp.stack(outs, axis=0), (1, 0, 2))


if __name__ == "__main__":
    B, in_dim, out_dim, receptors = 2, 32, 32, 4

    key = jax.random.PRNGKey(0)
    kx, kw, kb = jax.random.split(key, 3)

    x = jax.random.normal(kx, (B, in_dim), dtype=jnp.float32)

    # Deterministic parameter init (PyTorch Linear-style uniform bound),
    # stored directly in (R, in_dim, out_dim), i.e. W^T relative to torch.
    bound = 1.0 / np.sqrt(in_dim)
    weights = jax.random.uniform(
        kw, (receptors, in_dim, out_dim), minval=-bound, maxval=bound,
        dtype=jnp.float32)
    biases = jax.random.uniform(
        kb, (receptors, out_dim), minval=-bound, maxval=bound,
        dtype=jnp.float32)

    # One-time fusion/padding of the parameters (hoisted out of the call path).
    w_fused, b_fused = fuse_receptor_params(weights, biases)
    w_fused, b_fused = jax.block_until_ready((w_fused, b_fused))

    out = multi_scale_receptors(
        x, w_fused, b_fused, receptors=receptors, out_dim=out_dim)
    out = jax.block_until_ready(out)

    ref = _reference(x, weights, biases)
    assert out.shape == (B, receptors, out_dim), out.shape
    np.testing.assert_allclose(np.asarray(out), np.asarray(ref),
                               rtol=1e-5, atol=1e-5)

    print("KERNEL_OK")
</pallas_src>

<mosaic_0001>
module attributes {stable_mosaic.version = 11 : i64} {
  func.func @_fused_linear_single_k_kernel(%arg0: i32, %arg1: i32, %arg2: memref<8x128xf32, #tpu.memory_space<vmem>>, %arg3: memref<128x128xf32, #tpu.memory_space<vmem>>, %arg4: memref<1x128xf32, #tpu.memory_space<vmem>>, %arg5: memref<8x128xf32, #tpu.memory_space<vmem>>) attributes {dimension_semantics = [#tpu.dimension_semantics<parallel>, #tpu.dimension_semantics<parallel>], iteration_bounds = array<i64: 1, 1>, scalar_prefetch = 0 : i64, scratch_operands = 0 : i64, tpu.core_type = #tpu.core_type<tc>, window_params = [{transform_indices = @transform_0, window_bounds = array<i64: 8, 128>}, {transform_indices = @transform_1, window_bounds = array<i64: 128, 128>}, {transform_indices = @transform_2, window_bounds = array<i64: 1, 128>}, {transform_indices = @transform_3, window_bounds = array<i64: 8, 128>}]} {
    %c0 = arith.constant 0 : index
    %c0_0 = arith.constant 0 : index
    %0 = vector.load %arg2[%c0, %c0_0] : memref<8x128xf32, #tpu.memory_space<vmem>>, vector<8x128xf32>
    %c0_1 = arith.constant 0 : index
    %c0_2 = arith.constant 0 : index
    %1 = vector.load %arg3[%c0_1, %c0_2] : memref<128x128xf32, #tpu.memory_space<vmem>>, vector<128x128xf32>
    %cst = arith.constant dense<0.000000e+00> : vector<8x128xf32>
    %2 = tpu.matmul %0, %1, %cst {dimension_numbers = #tpu.dot_dimension_numbers<[1], [0], [0], [1], [0, 0, 1, 1], [], []>} : vector<8x128xf32>, vector<128x128xf32>, vector<8x128xf32> -> vector<8x128xf32>
    %c0_3 = arith.constant 0 : index
    %c0_4 = arith.constant 0 : index
    %3 = vector.load %arg4[%c0_3, %c0_4] : memref<1x128xf32, #tpu.memory_space<vmem>>, vector<1x128xf32>
    %4 = vector.broadcast %3 : vector<1x128xf32> to vector<8x128xf32>
    %5 = arith.addf %2, %4 : vector<8x128xf32>
    %c0_5 = arith.constant 0 : index
    %c0_6 = arith.constant 0 : index
    %6 = vector.load %arg5[%c0_5, %c0_6] : memref<8x128xf32, #tpu.memory_space<vmem>>, vector<8x128xf32>
    tpu.vector_store %arg5[%c0_5, %c0_6], %5 {strides = array<i32>} : memref<8x128xf32, #tpu.memory_space<vmem>>, vector<8x128xf32>,
    return
  }
  func.func @transform_0(%arg0: i32, %arg1: i32) -> (i32, i32) {
    %c0_i32 = arith.constant 0 : i32
    %c0_i32_0 = arith.constant 0 : i32
    return %arg0, %c0_i32 : i32, i32
  }
  func.func @transform_1(%arg0: i32, %arg1: i32) -> (i32, i32) {
    %c0_i32 = arith.constant 0 : i32
    %c0_i32_0 = arith.constant 0 : i32
    return %c0_i32, %arg1 : i32, i32
  }
  func.func @transform_2(%arg0: i32, %arg1: i32) -> (i32, i32) {
    %c0_i32 = arith.constant 0 : i32
    %c0_i32_0 = arith.constant 0 : i32
    return %c0_i32, %arg1 : i32, i32
  }
  func.func @transform_3(%arg0: i32, %arg1: i32) -> (i32, i32) {
    %c0_i32 = arith.constant 0 : i32
    return %arg0, %arg1 : i32, i32
  }
}

</mosaic_0001>

<bundles_post_ra>
// kernel: multi_scale_receptors.1
= control target key start
LH: loop header
LB: loop body
LE: loop exit
PB: predicated region body
PF: predicated region fallthrough
CT: control target
= control target key end

     0   :  { %8 = vsyncpa [#allocation3], 0  ;;  %s208_s12 = smov [#allocation2]   ;;  %s245_s0 = inlined_call_operand.vmem [shape: f32[8,128], index: 0, kind: input, shape index: {}]   ;;  %s246_s1 = inlined_call_operand.hbm [shape: f32[128,128], index: 1, kind: input, shape index: {}]   ;;  %s247_s2 = inlined_call_operand.vmem [shape: f32[1,128], index: 2, kind: input, shape index: {}]   ;;  %s248_s3 = inlined_call_operand.vmem [shape: f32[8,128], index: 3, kind: output, shape index: {}]  }
   0x1   :  { %s16_s13 = sshll.u32 %s208_s12, 4  ;;  %s17_s13 = int_to_ptr.vmem [resolvable:$true] %s16_s13 }
   0x2   :  { %s194_s14 = scalar_lea.vmem %s17_s13, 2048  ;;  %p199_p1 = scmp.lt.s32.totalorder %s17_s13, %s17_s13 }
   0x3   :  { %p195_p0 = scmp.ne.s32.totalorder %s17_s13, %s194_s14  ;;  %p200_p2 = scmp.lt.s32.totalorder %s194_s14, %s194_s14 }
   0x5   :  { %p201_p3 = por %p200_p2, %p199_p1 }
   0x7   :  { %p202_p4 = pnand %p201_p3, %p195_p0 }
   0x9   :  { %205 = shalt.err (!%p202_p4)
}
   0xa   :  { %s209_s15 = smov 128   ;;  %s210_s16 = smov 8  }
   0xb   :  { %22 = dma.hbm_to_vmem [thread:$0]  %s246_s1, 2048, %s17_s13, [#allocation3], %s209_s15, %s209_s15, %s210_s16  }
   0xc   :  { %206 = dma.done.wait [#allocation3], 2048  }
   0xd   :  { %207 = vsyncadd [#allocation3], 4294965248  ;;  %v211_v0 = vmov 0.0   ;;  %vm212_vm0 = vmmov 0   ;;  %v44_v1 = vld [vmem:[#allocation2 + $0x78] sm:$0xff]  ;;  %v43_v2 = vld [vmem:[#allocation2 + $0x70] sm:$0xff] }
   0xe   :  { %146 = vmatprep.subr.mxu0 %v211_v0  ;;  %178 = vmatprep.mubr.msk.f32.mxu0 %vm212_vm0, %v211_v0  ;;  %v42_v3 = vld [vmem:[#allocation2 + $0x68] sm:$0xff]  ;;  %v41_v4 = vld [vmem:[#allocation2 + $0x60] sm:$0xff]  ;;  %v40_v5 = vld [vmem:[#allocation2 + $0x58] sm:$0xff] }
   0xf   :  { %147 = vmatpush3.msra.mxu0 %v44_v1  ;;  %v39_v6 = vld [vmem:[#allocation2 + $0x50] sm:$0xff]  ;;  %v38_v7 = vld [vmem:[#allocation2 + $0x48] sm:$0xff]  ;;  %v37_v8 = vld [vmem:[#allocation2 + $0x40] sm:$0xff] }
  0x10   :  { %148 = vmatprep.subr.mxu0 %v211_v0  ;;  %v36_v9 = vld [vmem:[#allocation2 + $0x38] sm:$0xff]  ;;  %v35_v10 = vld [vmem:[#allocation2 + $0x30] sm:$0xff]  ;;  %v34_v11 = vld [vmem:[#allocation2 + $0x28] sm:$0xff] }
  0x11   :  { %149 = vmatpush3.msra.mxu0 %v43_v2  ;;  %v33_v12 = vld [vmem:[#allocation2 + $0x20] sm:$0xff]  ;;  %v32_v13 = vld [vmem:[#allocation2 + $0x18] sm:$0xff]  ;;  %v31_v14 = vld [vmem:[#allocation2 + $0x10] sm:$0xff] }
  0x12   :  { %150 = vmatprep.subr.mxu0 %v211_v0  ;;  %v30_v15 = vld [vmem:[#allocation2 + $0x8] sm:$0xff]  ;;  %v29_v16 = vld [vmem:[#allocation2] sm:$0xff] }
  0x13   :  { %151 = vmatpush3.msra.mxu0 %v42_v3  ;;  %v28_v17 = vld [vmem:[%s245_s0] sm:$0xff] }
  0x14   :  { %152 = vmatprep.subr.mxu0 %v211_v0  ;;  %v128_v18 = vld [vmem:[%s247_s2] ss:$0 sm:$0xff] }
  0x15   :  { %153 = vmatpush3.msra.mxu0 %v41_v4 }
  0x16   :  { %154 = vmatprep.subr.mxu0 %v211_v0 }
  0x17   :  { %155 = vmatpush3.msra.mxu0 %v40_v5 }
  0x18   :  { %156 = vmatprep.subr.mxu0 %v211_v0 }
  0x19   :  { %157 = vmatpush3.msra.mxu0 %v39_v6 }
  0x1a   :  { %158 = vmatprep.subr.mxu0 %v211_v0 }
  0x1b   :  { %159 = vmatpush3.msra.mxu0 %v38_v7 }
  0x1c   :  { %160 = vmatprep.subr.mxu0 %v211_v0 }
  0x1d   :  { %161 = vmatpush3.msra.mxu0 %v37_v8 }
  0x1e   :  { %162 = vmatprep.subr.mxu0 %v211_v0 }
  0x1f   :  { %163 = vmatpush3.msra.mxu0 %v36_v9 }
  0x20   :  { %164 = vmatprep.subr.mxu0 %v211_v0 }
  0x21   :  { %165 = vmatpush3.msra.mxu0 %v35_v10 }
  0x22   :  { %166 = vmatprep.subr.mxu0 %v211_v0 }
  0x23   :  { %167 = vmatpush3.msra.mxu0 %v34_v11 }
  0x24   :  { %168 = vmatprep.subr.mxu0 %v211_v0 }
  0x25   :  { %169 = vmatpush3.msra.mxu0 %v33_v12 }
  0x26   :  { %170 = vmatprep.subr.mxu0 %v211_v0 }
  0x27   :  { %171 = vmatpush3.msra.mxu0 %v32_v13 }
  0x28   :  { %172 = vmatprep.subr.mxu0 %v211_v0 }
  0x29   :  { %173 = vmatpush3.msra.mxu0 %v31_v14 }
  0x2a   :  { %174 = vmatprep.subr.mxu0 %v211_v0 }
  0x2b   :  { %175 = vmatpush3.msra.mxu0 %v30_v15 }
  0x2c   :  { %176 = vmatprep.subr.mxu0 %v211_v0 }
  0x2d   :  { %177 = vmatpush3.msra.mxu0 %v29_v16 }
  0x2e   :  { %179 = vmatmul.mubr.f32.vlgmr.msra.gmra.mxu0 %v28_v17 }
  0xee   :  { %v118_v19 = vpop.f32.mrf.mxu0 }
  0xef   :  { %v119_v20 = vadd.f32 %v128_v18, %v118_v19 }
  0xf0   :  { %v180_v21 = vpop.f32.mrf.mxu0 }
  0xf1   :  { %122 = vst [vmem:[%s248_s3] sm:$0xff] %v119_v20 }
  0xf2   :  { %127 = vsyncpa [#allocation3], 1 }

</bundles_post_ra>
